<compile_context>
chip_gen: v7x
topology: tpu7x:2x2x1
jax: 0.10.0
libtpu: 0.0.40
codegen_flags: <defaults>
</compile_context>

<pallas_src>
import jax
import jax.numpy as jnp
from jax.experimental import pallas as pl
from jax.experimental.pallas import tpu as pltpu


def _round_up(x, m):
    return ((x + m - 1) // m) * m


def _sublane_multiple(dtype):
    # f32 -> 8, bf16/f16 -> 16, int8/fp8 -> 32 (sub-32-bit dtypes pack rows).
    return 32 // jnp.dtype(dtype).itemsize


def slot2prompt_kernel(slots_ref, w_slot_ref, b_slot_ref,
                       w1_ref, b1_ref, w2_ref, b2_ref, out_ref):
    # Grid: (L tile l  [outer, parallel], batch tile b [inner, arbitrary]).
    # Gate + weighted-sum + first Linear are recomputed per grid step; this is
    # deliberately stateless so the L axis can be sharded across TensorCores.
    slots = slots_ref[...].astype(jnp.float32)                      # (TB, n, key_d)
    w_slot = w_slot_ref[...].astype(jnp.float32).reshape(1, 1, -1)  # (1, 1, key_d)

    # --- gate selector: sigmoid(Linear(key_d -> 1)) --------------------------
    # lane-axis (XLU) reduction instead of a lane-width-1 matmul.
    logits = jnp.sum(slots * w_slot, axis=-1, keepdims=True)        # (TB, n, 1)
    weights = jax.nn.sigmoid(logits + b_slot_ref[0, 0])             # (TB, n, 1)

    # --- weighted sum over slots (sublane reduction) --------------------------
    weighted = jnp.sum(weights * slots, axis=1)                     # (TB, key_d)

    # --- first Linear + ReLU (f32 accumulation) -------------------------------
    h1 = jnp.dot(weighted, w1_ref[...],
                 preferred_element_type=jnp.float32) + b1_ref[...].astype(jnp.float32)
    h1 = jnp.maximum(h1, 0.0)                                       # (TB, hidden)

    # --- second Linear on the current L tile (the HBM-heavy operand) ----------
    out = jnp.dot(h1.astype(w2_ref.dtype), w2_ref[...],
                  preferred_element_type=jnp.float32) + b2_ref[...].astype(jnp.float32)
    out_ref[...] = out.astype(out_ref.dtype)                        # (TB, TN)


def slot2prompt_forward(slots, params, e_p_length, emb_d, *,
                        max_single_tile_bs=512,
                        vmem_budget_bytes=12 * 1024 * 1024):
    bs, n, key_d = slots.shape
    L = e_p_length * emb_d
    hidden = 2 * key_d

    w_slot, b_slot, w1, b1, w2, b2 = (
        params["w_slot"], params["b_slot"],
        params["w1"], params["b1"], params["w2"], params["b2"],
    )
    itemsize = jnp.dtype(slots.dtype).itemsize

    # ---- batch tiling --------------------------------------------------------
    # bs <= max_single_tile_bs: one M tile covering the whole batch (block ==
    # full array dim, so no sublane-divisibility requirement and no jnp.pad of
    # slots).  Larger batches: 256-row tiles (dtype-aligned) on the INNER axis.
    if bs <= max_single_tile_bs:
        TB = bs
        bs_pad = bs
    else:
        TB = _round_up(256, _sublane_multiple(slots.dtype))
        bs_pad = _round_up(bs, TB)
        if bs_pad != bs:
            slots = jnp.pad(slots, ((0, bs_pad - bs), (0, 0), (0, 0)))

    # ---- L tiling ------------------------------------------------------------
    # Pick the largest TN whose double-buffered working set (W2 + b2 + out
    # tiles, plus resident slots / W1 / b1) fits the VMEM budget.
    L128 = _round_up(L, 128)
    fixed_bytes = 2 * (TB * n * key_d + key_d * hidden + hidden) * itemsize
    TN = 128
    for cand in (4096, 2048, 1024, 512, 256, 128):
        if cand > L128:
            continue
        tile_bytes = 2 * (hidden * cand + cand + TB * cand) * itemsize
        if fixed_bytes + tile_bytes <= vmem_budget_bytes:
            TN = cand
            break
    L_pad = _round_up(L, TN)
    if L_pad != L:
        # Zero-pad W2 output columns: keeps every output block a lane-dense
        # multiple of 128 (no masked vst) and every W2 tile full-size.
        w2 = jnp.pad(w2, ((0, 0), (0, L_pad - L)))
        b2 = jnp.pad(b2, ((0, 0), (0, L_pad - L)))

    # Grid: L tiles OUTER, batch tiles INNER -> each W2 block is fetched once
    # in total (single HBM pass over W2).
    grid = (L_pad // TN, bs_pad // TB)

    out_flat = pl.pallas_call(
        slot2prompt_kernel,
        out_shape=jax.ShapeDtypeStruct((bs_pad, L_pad), slots.dtype),
        grid_spec=pltpu.PrefetchScalarGridSpec(
            num_scalar_prefetch=0,
            grid=grid,
            in_specs=[
                pl.BlockSpec((TB, n, key_d), lambda l, b: (b, 0, 0)),   # slots
                pl.BlockSpec((1, key_d), lambda l, b: (0, 0)),          # w_slot (resident)
                pl.BlockSpec(memory_space=pltpu.MemorySpace.SMEM),      # b_slot (scalar)
                pl.BlockSpec((key_d, hidden), lambda l, b: (0, 0)),     # W1 (resident)
                pl.BlockSpec((1, hidden), lambda l, b: (0, 0)),         # b1 (resident)
                pl.BlockSpec((hidden, TN), lambda l, b: (0, l)),        # W2 (one HBM pass)
                pl.BlockSpec((1, TN), lambda l, b: (0, l)),             # b2 (L-tiled)
            ],
            out_specs=pl.BlockSpec((TB, TN), lambda l, b: (b, l)),
        ),
        compiler_params=pltpu.CompilerParams(
            # L axis parallel: on v7x megacore each core streams half of W2.
            # Batch axis sequential (inner loop).
            dimension_semantics=("parallel", "arbitrary")),
    )(slots, w_slot, b_slot, w1, b1, w2, b2)

    return out_flat[:bs, :L].reshape(bs, e_p_length, emb_d)


def reference_forward(slots, params, e_p_length, emb_d):
    bs = slots.shape[0]
    logits = jnp.einsum("bnh,h->bn", slots, params["w_slot"][0]) + params["b_slot"][0, 0]
    weights = jax.nn.sigmoid(logits)[..., None]
    weighted = jnp.sum(weights * slots, axis=1)
    h1 = jnp.maximum(weighted @ params["w1"] + params["b1"][0], 0.0)
    out = h1 @ params["w2"] + params["b2"][0]
    return out.reshape(bs, e_p_length, emb_d)


def init_params(key, key_d, e_p_length, emb_d, dtype=jnp.float32):
    hidden = 2 * key_d
    L = e_p_length * emb_d
    ks = jax.random.split(key, 6)
    # Deterministic synthetic init (roughly Linear-like scaling).
    return {
        "w_slot": jax.random.normal(ks[0], (1, key_d), dtype) * (1.0 / key_d**0.5),
        "b_slot": jax.random.normal(ks[1], (1, 1), dtype) * 0.01,
        "w1": jax.random.normal(ks[2], (key_d, hidden), dtype) * (1.0 / key_d**0.5),
        "b1": jax.random.normal(ks[3], (1, hidden), dtype) * 0.01,
        "w2": jax.random.normal(ks[4], (hidden, L), dtype) * (1.0 / hidden**0.5),
        "b2": jax.random.normal(ks[5], (1, L), dtype) * 0.01,
    }


if __name__ == "__main__":
    # Small shapes consistent with the module: emb_d=32, key_dim=128,
    # e_p_length=8; slots of shape (batch, n_slots, key_dim).
    bs, n, key_d = 2, 8, 128
    emb_d, e_p_length = 32, 8

    key = jax.random.PRNGKey(0)
    k_slots, k_params = jax.random.split(key)
    slots = jax.random.normal(k_slots, (bs, n, key_d), jnp.float32)
    params = init_params(k_params, key_d, e_p_length, emb_d)

    prompts = slot2prompt_forward(slots, params, e_p_length, emb_d)
    jax.block_until_ready(prompts)

    ref = reference_forward(slots, params, e_p_length, emb_d)
    assert prompts.shape == (bs, e_p_length, emb_d)
    assert jnp.allclose(prompts, ref, atol=2e-4, rtol=2e-4), \
        float(jnp.max(jnp.abs(prompts - ref)))

    print("KERNEL_OK")
</pallas_src>

<mosaic_0001>
module attributes {stable_mosaic.version = 11 : i64} {
  func.func @slot2prompt_kernel(%arg0: i32, %arg1: i32, %arg2: memref<2x8x128xf32, #tpu.memory_space<vmem>>, %arg3: memref<1x128xf32, #tpu.memory_space<vmem>>, %arg4: memref<1x1xf32, #tpu.memory_space<smem>>, %arg5: memref<128x256xf32, #tpu.memory_space<vmem>>, %arg6: memref<1x256xf32, #tpu.memory_space<vmem>>, %arg7: memref<256x256xf32, #tpu.memory_space<vmem>>, %arg8: memref<1x256xf32, #tpu.memory_space<vmem>>, %arg9: memref<2x256xf32, #tpu.memory_space<vmem>>) attributes {dimension_semantics = [#tpu.dimension_semantics<parallel>, #tpu.dimension_semantics<arbitrary>], iteration_bounds = array<i64: 1, 1>, scalar_prefetch = 0 : i64, scratch_operands = 0 : i64, tpu.core_type = #tpu.core_type<tc>, window_params = [{transform_indices = @transform_0, window_bounds = array<i64: 2, 8, 128>}, {pipeline_mode = #tpu.pipeline_mode<synchronous>, transform_indices = @transform_1, window_bounds = array<i64: 1, 128>}, {transform_indices = @transform_2, window_bounds = array<i64: 1, 1>}, {pipeline_mode = #tpu.pipeline_mode<synchronous>, transform_indices = @transform_3, window_bounds = array<i64: 128, 256>}, {pipeline_mode = #tpu.pipeline_mode<synchronous>, transform_indices = @transform_4, window_bounds = array<i64: 1, 256>}, {transform_indices = @transform_5, window_bounds = array<i64: 256, 256>}, {transform_indices = @transform_6, window_bounds = array<i64: 1, 256>}, {transform_indices = @transform_7, window_bounds = array<i64: 2, 256>}]} {
    %c0 = arith.constant 0 : index
    %c0_0 = arith.constant 0 : index
    %c0_1 = arith.constant 0 : index
    %0 = vector.load %arg2[%c0, %c0_0, %c0_1] : memref<2x8x128xf32, #tpu.memory_space<vmem>>, vector<2x8x128xf32>
    %c0_2 = arith.constant 0 : index
    %c0_3 = arith.constant 0 : index
    %1 = vector.load %arg3[%c0_2, %c0_3] : memref<1x128xf32, #tpu.memory_space<vmem>>, vector<1x128xf32>
    %2 = vector.shape_cast %1 : vector<1x128xf32> to vector<1x1x128xf32>
    %3 = vector.broadcast %2 : vector<1x1x128xf32> to vector<2x8x128xf32>
    %4 = arith.mulf %0, %3 : vector<2x8x128xf32>
    %cst = arith.constant dense<0.000000e+00> : vector<2x8xf32>
    %5 = vector.multi_reduction <add>, %4, %cst [2] : vector<2x8x128xf32> to vector<2x8xf32>
    %6 = vector.shape_cast %5 : vector<2x8xf32> to vector<2x8x1xf32>
    %c0_4 = arith.constant 0 : index
    %c0_5 = arith.constant 0 : index
    %7 = memref.load %arg4[%c0_4, %c0_5] : memref<1x1xf32, #tpu.memory_space<smem>>
    %8 = vector.broadcast %7 : f32 to vector<2x8x1xf32>
    %9 = arith.addf %6, %8 : vector<2x8x1xf32>
    %10 = arith.negf %9 : vector<2x8x1xf32>
    %11 = math.exp %10 : vector<2x8x1xf32>
    %cst_6 = arith.constant 1.000000e+00 : f32
    %12 = vector.broadcast %cst_6 : f32 to vector<2x8x1xf32>
    %13 = arith.addf %12, %11 : vector<2x8x1xf32>
    %14 = arith.divf %12, %13 : vector<2x8x1xf32>
    %15 = vector.broadcast %14 : vector<2x8x1xf32> to vector<2x8x128xf32>
    %16 = arith.mulf %15, %0 : vector<2x8x128xf32>
    %cst_7 = arith.constant dense<0.000000e+00> : vector<2x128xf32>
    %17 = vector.multi_reduction <add>, %16, %cst_7 [1] : vector<2x8x128xf32> to vector<2x128xf32>
    %c0_8 = arith.constant 0 : index
    %c0_9 = arith.constant 0 : index
    %18 = vector.load %arg5[%c0_8, %c0_9] : memref<128x256xf32, #tpu.memory_space<vmem>>, vector<128x256xf32>
    %cst_10 = arith.constant dense<0.000000e+00> : vector<2x256xf32>
    %19 = tpu.matmul %17, %18, %cst_10 {dimension_numbers = #tpu.dot_dimension_numbers<[1], [0], [0], [1], [0, 0, 1, 1], [], []>} : vector<2x128xf32>, vector<128x256xf32>, vector<2x256xf32> -> vector<2x256xf32>
    %c0_11 = arith.constant 0 : index
    %c0_12 = arith.constant 0 : index
    %20 = vector.load %arg6[%c0_11, %c0_12] : memref<1x256xf32, #tpu.memory_space<vmem>>, vector<1x256xf32>
    %21 = vector.broadcast %20 : vector<1x256xf32> to vector<2x256xf32>
    %22 = arith.addf %19, %21 : vector<2x256xf32>
    %cst_13 = arith.constant 0.000000e+00 : f32
    %23 = vector.broadcast %cst_13 : f32 to vector<2x256xf32>
    %24 = arith.maximumf %22, %23 : vector<2x256xf32>
    %c0_14 = arith.constant 0 : index
    %c0_15 = arith.constant 0 : index
    %25 = vector.load %arg7[%c0_14, %c0_15] : memref<256x256xf32, #tpu.memory_space<vmem>>, vector<256x256xf32>
    %cst_16 = arith.constant dense<0.000000e+00> : vector<2x256xf32>
    %26 = tpu.matmul %24, %25, %cst_16 {dimension_numbers = #tpu.dot_dimension_numbers<[1], [0], [0], [1], [0, 0, 1, 1], [], []>} : vector<2x256xf32>, vector<256x256xf32>, vector<2x256xf32> -> vector<2x256xf32>
    %c0_17 = arith.constant 0 : index
    %c0_18 = arith.constant 0 : index
    %27 = vector.load %arg8[%c0_17, %c0_18] : memref<1x256xf32, #tpu.memory_space<vmem>>, vector<1x256xf32>
    %28 = vector.broadcast %27 : vector<1x256xf32> to vector<2x256xf32>
    %29 = arith.addf %26, %28 : vector<2x256xf32>
    %c0_19 = arith.constant 0 : index
    %c0_20 = arith.constant 0 : index
    %30 = vector.load %arg9[%c0_19, %c0_20] : memref<2x256xf32, #tpu.memory_space<vmem>>, vector<2x256xf32>
    tpu.vector_store %arg9[%c0_19, %c0_20], %29 {strides = array<i32>} : memref<2x256xf32, #tpu.memory_space<vmem>>, vector<2x256xf32>,
    return
  }
  func.func @transform_0(%arg0: i32, %arg1: i32) -> (i32, i32, i32) {
    %c0_i32 = arith.constant 0 : i32
    %c0_i32_0 = arith.constant 0 : i32
    %c0_i32_1 = arith.constant 0 : i32
    return %arg1, %c0_i32, %c0_i32_0 : i32, i32, i32
  }
  func.func @transform_1(%arg0: i32, %arg1: i32) -> (i32, i32) {
    %c0_i32 = arith.constant 0 : i32
    %c0_i32_0 = arith.constant 0 : i32
    %c0_i32_1 = arith.constant 0 : i32
    return %c0_i32, %c0_i32_0 : i32, i32
  }
  func.func @transform_2(%arg0: i32, %arg1: i32) -> (i32, i32) {
    %c0_i32 = arith.constant 0 : i32
    %c0_i32_0 = arith.constant 0 : i32
    %c0_i32_1 = arith.constant 0 : i32
    return %c0_i32, %c0_i32_0 : i32, i32
  }
  func.func @transform_3(%arg0: i32, %arg1: i32) -> (i32, i32) {
    %c0_i32 = arith.constant 0 : i32
    %c0_i32_0 = arith.constant 0 : i32
    %c0_i32_1 = arith.constant 0 : i32
    return %c0_i32, %c0_i32_0 : i32, i32
  }
  func.func @transform_4(%arg0: i32, %arg1: i32) -> (i32, i32) {
    %c0_i32 = arith.constant 0 : i32
    %c0_i32_0 = arith.constant 0 : i32
    %c0_i32_1 = arith.constant 0 : i32
    return %c0_i32, %c0_i32_0 : i32, i32
  }
  func.func @transform_5(%arg0: i32, %arg1: i32) -> (i32, i32) {
    %c0_i32 = arith.constant 0 : i32
    %c0_i32_0 = arith.constant 0 : i32
    return %c0_i32, %arg0 : i32, i32
  }
  func.func @transform_6(%arg0: i32, %arg1: i32) -> (i32, i32) {
    %c0_i32 = arith.constant 0 : i32
    %c0_i32_0 = arith.constant 0 : i32
    return %c0_i32, %arg0 : i32, i32
  }
  func.func @transform_7(%arg0: i32, %arg1: i32) -> (i32, i32) {
    %c0_i32 = arith.constant 0 : i32
    return %arg1, %arg0 : i32, i32
  }
}

</mosaic_0001>

<bundles_post_ra>
// kernel: tpu_custom_call.1
= control target key start
LH: loop header
LB: loop body
LE: loop exit
PB: predicated region body
PF: predicated region fallthrough
CT: control target
= control target key end

     0   :  { %13 = vsyncpa [#allocation4], 0  ;;  %s745_s0 = inlined_call_operand.hbm [shape: f32[2,8,128], index: 0, kind: input, shape index: {}]   ;;  %s746_s1 = inlined_call_operand.vmem [shape: f32[1,128], index: 1, kind: input, shape index: {}]   ;;  %s747_s2 = inlined_call_operand.<no memory space> [shape: f32[1,1], index: 2, kind: input, shape index: {}]   ;;  %s748_s3 = inlined_call_operand.hbm [shape: f32[128,256], index: 3, kind: input, shape index: {}]   ;;  %s749_s4 = inlined_call_operand.vmem [shape: f32[1,256], index: 4, kind: input, shape index: {}]   ;;  %s750_s5 = inlined_call_operand.hbm [shape: f32[256,256], index: 5, kind: input, shape index: {}]   ;;  %s751_s6 = inlined_call_operand.vmem [shape: f32[1,256], index: 6, kind: input, shape index: {}]   ;;  %s752_s7 = inlined_call_operand.hbm [shape: f32[2,256], index: 7, kind: output, shape index: {}]  }
   0x1   :  { %14 = vsyncpa [#allocation7], 0 }
   0x2   :  { %15 = vsyncpa [#allocation5], 0  ;;  %s622_s24 = smov [#allocation6]   ;;  %s528_s28 = scalar_lea.hbm %s748_s3, 4096 }
   0x3   :  { %s37_s25 = sshll.u32 %s622_s24, 4  ;;  %p529_p0 = scmp.ne.s32.totalorder %s748_s3, %s528_s28  ;;  %s38_s25 = int_to_ptr.vmem [resolvable:$true] %s37_s25 }
   0x4   :  { %p532_p1 = scmp.lt.u32.totalorder %s528_s28, %s748_s3 }
   0x6   :  { %p534_p2 = pnand %p532_p1, %p529_p0 }
   0x8   :  { %537 = shalt.err (!%p534_p2)
}
   0x9   :  { %s538_s10 = scalar_lea.vmem %s38_s25, 4096  ;;  %p543_p4 = scmp.lt.s32.totalorder %s38_s25, %s38_s25 }
   0xa   :  { %p539_p3 = scmp.ne.s32.totalorder %s38_s25, %s538_s10  ;;  %p544_p5 = scmp.lt.s32.totalorder %s538_s10, %s538_s10 }
   0xc   :  { %p545_p6 = por %p544_p5, %p543_p4 }
   0xe   :  { %p546_p7 = pnand %p545_p6, %p539_p3 }
  0x10   :  { %549 = shalt.err (!%p546_p7)
}
  0x11   :  { %s623_s11 = smov 256   ;;  %s624_s12 = smov 16  }
  0x12   :  { %43 = dma.hbm_to_vmem [thread:$0]  %s748_s3, 4096, %s38_s25, [#allocation7], %s623_s11, %s623_s11, %s624_s12  }
  0x13   :  { %s625_s15 = smov [#allocation3]   ;;  %s550_s19 = scalar_lea.hbm %s745_s0, 256 }
  0x14   :  { %s21_s16 = sshll.u32 %s625_s15, 4  ;;  %p551_p8 = scmp.ne.s32.totalorder %s745_s0, %s550_s19  ;;  %s22_s16 = int_to_ptr.vmem [resolvable:$true] %s21_s16 }
  0x15   :  { %p554_p9 = scmp.lt.u32.totalorder %s550_s19, %s745_s0 }
  0x17   :  { %p556_p10 = pnand %p554_p9, %p551_p8 }
  0x19   :  { %559 = shalt.err (!%p556_p10)
}
  0x1a   :  { %s560_s24 = scalar_lea.vmem %s22_s16, 256  ;;  %p565_p12 = scmp.lt.s32.totalorder %s22_s16, %s22_s16 }
  0x1b   :  { %p561_p11 = scmp.ne.s32.totalorder %s22_s16, %s560_s24  ;;  %p566_p13 = scmp.lt.s32.totalorder %s560_s24, %s560_s24 }
  0x1d   :  { %p567_p0 = por %p566_p13, %p565_p12 }
  0x1f   :  { %p568_p1 = pnand %p567_p0, %p561_p11 }
  0x21   :  { %571 = shalt.err (!%p568_p1)
}
  0x22   :  { %s626_s3 = smov 128   ;;  %s627_s25 = smov 8  }
  0x23   :  { %27 = dma.hbm_to_vmem [thread:$0]  %s745_s0, 256, %s22_s16, [#allocation4], %s626_s3, %s626_s3, %s627_s25  }
  0x24   :  { %s628_s28 = smov [#allocation8]   ;;  %s572_s9 = scalar_lea.hbm %s750_s5, 8192 }
  0x25   :  { %s51_s29 = sshll.u32 %s628_s28, 4  ;;  %p573_p2 = scmp.ne.s32.totalorder %s750_s5, %s572_s9  ;;  %s52_s29 = int_to_ptr.vmem [resolvable:$true] %s51_s29 }
  0x26   :  { %p576_p3 = scmp.lt.u32.totalorder %s572_s9, %s750_s5 }
  0x28   :  { %p578_p4 = pnand %p576_p3, %p573_p2 }
  0x2a   :  { %581 = shalt.err (!%p578_p4)
}
  0x2b   :  { %s582_s17 = scalar_lea.vmem %s52_s29, 8192  ;;  %p587_p6 = scmp.lt.s32.totalorder %s52_s29, %s52_s29 }
  0x2c   :  { %p583_p5 = scmp.ne.s32.totalorder %s52_s29, %s582_s17  ;;  %p588_p7 = scmp.lt.s32.totalorder %s582_s17, %s582_s17 }
  0x2e   :  { %p589_p8 = por %p588_p7, %p587_p6 }
  0x30   :  { %p590_p9 = pnand %p589_p8, %p583_p5 }
  0x32   :  { %593 = shalt.err (!%p590_p9)
}
  0x33   :  { %57 = dma.hbm_to_vmem [thread:$0]  %s750_s5, 8192, %s52_s29, [#allocation7], %s623_s11, %s623_s11, %s624_s12  }
  0x34   :  { %616 = dma.done.wait [#allocation4], 256  }
  0x35   :  { %617 = vsyncadd [#allocation4], 4294967040 }
  0x36   :  { %618 = dma.done.wait [#allocation7], 12288  }
  0x37   :  { %619 = vsyncadd [#allocation7], 4294955008  ;;  %v713_v0 = vld [vmem:[#allocation3] sm:$0xff]  ;;  %v718_v2 = vld [vmem:[#allocation3 + $0x8] sm:$0xff]  ;;  %v629_v27 = vmov 0.0   ;;  %vm160_vm0 = vcmask 1041409  }
  0x38   :  { %v411_v1 = vld [vmem:[%s746_s1] ss:$0 sm:$0xff]  ;;  %v115_v5 = vld [vmem:[#allocation6 + $0x8] sm:$0xff]  ;;  %v117_v6 = vld [vmem:[#allocation6 + $0x18] sm:$0xff]  ;;  %227 = vmatprep.mubr.f32.mxu0 %v629_v27 }
  0x39   :  { %v78_v3 = vmul.f32 %v411_v1, %v713_v0  ;;  %v79_v4 = vmul.f32 %v411_v1, %v718_v2  ;;  %v415_v7 = vpack.c.bf16 %v117_v6, %v115_v5  ;;  %v114_v8 = vld [vmem:[#allocation6] sm:$0xff]  ;;  %v116_v9 = vld [vmem:[#allocation6 + $0x10] sm:$0xff]  ;;  %v119_v11 = vld [vmem:[#allocation6 + $0x28] sm:$0xff] }
  0x3a   :  { %v417_v10 = vpack.c.bf16 %v116_v9, %v114_v8  ;;  %v121_v12 = vld [vmem:[#allocation6 + $0x38] sm:$0xff]  ;;  %v118_v14 = vld [vmem:[#allocation6 + $0x20] sm:$0xff]  ;;  %v120_v15 = vld [vmem:[#allocation6 + $0x30] sm:$0xff] }
  0x3b   :  { %80 = vadd.xlane.f32.xlu0 %v78_v3  ;;  %416 = vmatprep.subr.bf16.mxu0 %v415_v7  ;;  %v419_v13 = vpack.c.bf16 %v121_v12, %v119_v11  ;;  %v421_v16 = vpack.c.bf16 %v120_v15, %v118_v14  ;;  %v123_v17 = vld [vmem:[#allocation6 + $0x48] sm:$0xff]  ;;  %v125_v18 = vld [vmem:[#allocation6 + $0x58] sm:$0xff]  ;;  %v122_v20 = vld [vmem:[#allocation6 + $0x40] sm:$0xff] }
  0x3c   :  { %418 = vmatpush1.bf16.msra.mxu0 %v417_v10  ;;  %v423_v19 = vpack.c.bf16 %v125_v18, %v123_v17  ;;  %v124_v21 = vld [vmem:[#allocation6 + $0x50] sm:$0xff]  ;;  %v127_v22 = vld [vmem:[#allocation6 + $0x68] sm:$0xff]  ;;  %v129_v24 = vld [vmem:[#allocation6 + $0x78] sm:$0xff] }
  0x3d   :  { %420 = vmatprep.subr.bf16.mxu0 %v419_v13  ;;  %v425_v23 = vpack.c.bf16 %v124_v21, %v122_v20  ;;  %v126_v25 = vld [vmem:[#allocation6 + $0x60] sm:$0xff]  ;;  %v128_v26 = vld [vmem:[#allocation6 + $0x70] sm:$0xff]  ;;  %v427_v28 = vpack.c.bf16 %v129_v24, %v127_v22  ;;  %v131_v29 = vld [vmem:[#allocation6 + $0x88] sm:$0xff] }
  0x3e   :  { %v133_v30 = vld [vmem:[#allocation6 + $0x98] sm:$0xff]  ;;  %v429_v31 = vpack.c.bf16 %v128_v26, %v126_v25  ;;  %v130_v33 = vld [vmem:[#allocation6 + $0x80] sm:$0xff]  ;;  %v132_v34 = vld [vmem:[#allocation6 + $0x90] sm:$0xff] }
  0x3f   :  { %82 = vadd.xlane.f32.xlu0 %v79_v4  ;;  %v431_v32 = vpack.c.bf16 %v133_v30, %v131_v29  ;;  %v135_v35 = vld [vmem:[#allocation6 + $0xa8] sm:$0xff]  ;;  %v137_v36 = vld [vmem:[#allocation6 + $0xb8] sm:$0xff]  ;;  %v433_v37 = vpack.c.bf16 %v132_v34, %v130_v33  ;;  %v134_v39 = vld [vmem:[#allocation6 + $0xa0] sm:$0xff] }
  0x40   :  { %422 = vmatpush1.bf16.msra.mxu0 %v421_v16  ;;  %v435_v38 = vpack.c.bf16 %v137_v36, %v135_v35  ;;  %v136_v40 = vld [vmem:[#allocation6 + $0xb0] sm:$0xff]  ;;  %v139_v41 = vld [vmem:[#allocation6 + $0xc8] sm:$0xff]  ;;  %v141_v42 = vld [vmem:[#allocation6 + $0xd8] sm:$0xff] }
  0x41   :  { %424 = vmatprep.subr.bf16.mxu0 %v423_v19  ;;  %v437_v43 = vpack.c.bf16 %v136_v40, %v134_v39  ;;  %v439_v44 = vpack.c.bf16 %v141_v42, %v139_v41  ;;  %v138_v45 = vld [vmem:[#allocation6 + $0xc0] sm:$0xff]  ;;  %v140_v46 = vld [vmem:[#allocation6 + $0xd0] sm:$0xff]  ;;  %v143_v47 = vld [vmem:[#allocation6 + $0xe8] sm:$0xff] }
  0x42   :  { %v145_v48 = vld [vmem:[#allocation6 + $0xf8] sm:$0xff]  ;;  %v441_v49 = vpack.c.bf16 %v140_v46, %v138_v45  ;;  %v142_v51 = vld [vmem:[#allocation6 + $0xe0] sm:$0xff]  ;;  %v144_v52 = vld [vmem:[#allocation6 + $0xf0] sm:$0xff] }
  0x43   :  { %v443_v50 = vpack.c.bf16 %v145_v48, %v143_v47  ;;  %v445_v53 = vpack.c.bf16 %v144_v52, %v142_v51  ;;  %v237_v54 = vld [vmem:[#allocation8 + $0x8] sm:$0xff]  ;;  %v239_v55 = vld [vmem:[#allocation8 + $0x18] sm:$0xff]  ;;  %v236_v56 = vld [vmem:[#allocation8] sm:$0xff] }
  0x44   :  { %426 = vmatpush1.bf16.msra.mxu0 %v425_v23  ;;  %v447_v57 = vpack.c.bf16 %v239_v55, %v237_v54  ;;  %v238_v58 = vld [vmem:[#allocation8 + $0x10] sm:$0xff]  ;;  %v241_v59 = vld [vmem:[#allocation8 + $0x28] sm:$0xff]  ;;  %v243_v60 = vld [vmem:[#allocation8 + $0x38] sm:$0xff] }
  0x45   :  { %428 = vmatprep.subr.bf16.mxu0 %v427_v28  ;;  %v449_v61 = vpack.c.bf16 %v238_v58, %v236_v56  ;;  %v451_v62 = vpack.c.bf16 %v243_v60, %v241_v59  ;;  %v240_v63 = vld [vmem:[#allocation8 + $0x20] sm:$0xff]  ;;  %v242_v1 = vld [vmem:[#allocation8 + $0x30] sm:$0xff]  ;;  %v245_v3 = vld [vmem:[#allocation8 + $0x48] sm:$0xff] }
  0x46   :  { %448 = vmatprep.subr.bf16.mxu1 %v447_v57  ;;  %v247_v4 = vld [vmem:[#allocation8 + $0x58] sm:$0xff]  ;;  %v453_v5 = vpack.c.bf16 %v242_v1, %v240_v63  ;;  %v244_v7 = vld [vmem:[#allocation8 + $0x40] sm:$0xff]  ;;  %v246_v8 = vld [vmem:[#allocation8 + $0x50] sm:$0xff] }
  0x47   :  { %450 = vmatpush1.bf16.msra.mxu1 %v449_v61  ;;  %v455_v6 = vpack.c.bf16 %v247_v4, %v245_v3  ;;  %v249_v9 = vld [vmem:[#allocation8 + $0x68] sm:$0xff]  ;;  %v251_v10 = vld [vmem:[#allocation8 + $0x78] sm:$0xff]  ;;  %v457_v11 = vpack.c.bf16 %v246_v8, %v244_v7  ;;  %v248_v13 = vld [vmem:[#allocation8 + $0x60] sm:$0xff] }
  0x48   :  { %430 = vmatpush1.bf16.msra.mxu0 %v429_v31  ;;  %452 = vmatprep.subr.bf16.mxu1 %v451_v62  ;;  %v459_v12 = vpack.c.bf16 %v251_v10, %v249_v9  ;;  %v250_v14 = vld [vmem:[#allocation8 + $0x70] sm:$0xff]  ;;  %v253_v15 = vld [vmem:[#allocation8 + $0x88] sm:$0xff]  ;;  %v255_v16 = vld [vmem:[#allocation8 + $0x98] sm:$0xff] }
  0x49   :  { %432 = vmatprep.subr.bf16.mxu0 %v431_v32  ;;  %v461_v17 = vpack.c.bf16 %v250_v14, %v248_v13  ;;  %v463_v18 = vpack.c.bf16 %v255_v16, %v253_v15  ;;  %v252_v19 = vld [vmem:[#allocation8 + $0x80] sm:$0xff]  ;;  %v254_v20 = vld [vmem:[#allocation8 + $0x90] sm:$0xff]  ;;  %v257_v21 = vld [vmem:[#allocation8 + $0xa8] sm:$0xff] }
  0x4a   :  { %v259_v22 = vld [vmem:[#allocation8 + $0xb8] sm:$0xff]  ;;  %v465_v23 = vpack.c.bf16 %v254_v20, %v252_v19  ;;  %v256_v25 = vld [vmem:[#allocation8 + $0xa0] sm:$0xff]  ;;  %v258_v26 = vld [vmem:[#allocation8 + $0xb0] sm:$0xff] }
  0x4b   :  { %454 = vmatpush1.bf16.msra.mxu1 %v453_v5  ;;  %v467_v24 = vpack.c.bf16 %v259_v22, %v257_v21  ;;  %v261_v27 = vld [vmem:[#allocation8 + $0xc8] sm:$0xff]  ;;  %v263_v28 = vld [vmem:[#allocation8 + $0xd8] sm:$0xff]  ;;  %v469_v29 = vpack.c.bf16 %v258_v26, %v256_v25  ;;  %v260_v31 = vld [vmem:[#allocation8 + $0xc0] sm:$0xff] }
  0x4c   :  { %434 = vmatpush1.bf16.msra.mxu0 %v433_v37  ;;  %456 = vmatprep.subr.bf16.mxu1 %v455_v6  ;;  %v471_v30 = vpack.c.bf16 %v263_v28, %v261_v27  ;;  %v262_v32 = vld [vmem:[#allocation8 + $0xd0] sm:$0xff]  ;;  %v265_v33 = vld [vmem:[#allocation8 + $0xe8] sm:$0xff]  ;;  %v267_v34 = vld [vmem:[#allocation8 + $0xf8] sm:$0xff] }
  0x4d   :  { %436 = vmatprep.subr.bf16.mxu0 %v435_v38  ;;  %v473_v35 = vpack.c.bf16 %v262_v32, %v260_v31  ;;  %v475_v36 = vpack.c.bf16 %v267_v34, %v265_v33  ;;  %v264_v37 = vld [vmem:[#allocation8 + $0xe0] sm:$0xff]  ;;  %v266_v38 = vld [vmem:[#allocation8 + $0xf0] sm:$0xff]  ;;  %v269_v39 = vld [vmem:[#allocation8 + $0x108] sm:$0xff] }
  0x4e   :  { %v271_v40 = vld [vmem:[#allocation8 + $0x118] sm:$0xff]  ;;  %v477_v41 = vpack.c.bf16 %v266_v38, %v264_v37  ;;  %v273_v45 = vld [vmem:[#allocation8 + $0x128] sm:$0xff]  ;;  %v276_v55 = vld [vmem:[#allocation8 + $0x140] sm:$0xff] }
  0x4f   :  { %458 = vmatpush1.bf16.msra.mxu1 %v457_v11  ;;  %v479_v42 = vpack.c.bf16 %v271_v40, %v269_v39  ;;  %v275_v46 = vld [vmem:[#allocation8 + $0x138] sm:$0xff]  ;;  %v277_v51 = vld [vmem:[#allocation8 + $0x148] sm:$0xff]  ;;  %v278_v56 = vld [vmem:[#allocation8 + $0x150] sm:$0xff] }
  0x50   :  { %438 = vmatpush1.bf16.msra.mxu0 %v437_v43  ;;  %460 = vmatprep.subr.bf16.mxu1 %v459_v12  ;;  %v268_v43 = vld [vmem:[#allocation8 + $0x100] sm:$0xff]  ;;  %v483_v48 = vpack.c.bf16 %v275_v46, %v273_v45  ;;  %v279_v52 = vld [vmem:[#allocation8 + $0x158] sm:$0xff]  ;;  %v281_v57 = vld [vmem:[#allocation8 + $0x168] sm:$0xff]  ;;  %v489_v59 = vpack.c.bf16 %v278_v56, %v276_v55 }
  0x51   :  { %440 = vmatprep.subr.bf16.mxu0 %v439_v44  ;;  %v270_v44 = vld [vmem:[#allocation8 + $0x110] sm:$0xff]  ;;  %v487_v54 = vpack.c.bf16 %v279_v52, %v277_v51  ;;  %v283_v58 = vld [vmem:[#allocation8 + $0x178] sm:$0xff]  ;;  %v280_v61 = vld [vmem:[#allocation8 + $0x160] sm:$0xff]  ;;  %v148_v52 = vlaneseq }
  0x52   :  { %v481_v47 = vpack.c.bf16 %v270_v44, %v268_v43  ;;  %v491_v60 = vpack.c.bf16 %v283_v58, %v281_v57  ;;  %v282_v62 = vld [vmem:[#allocation8 + $0x170] sm:$0xff]  ;;  %v285_v63 = vld [vmem:[#allocation8 + $0x188] sm:$0xff]  ;;  %v287_v1 = vld [vmem:[#allocation8 + $0x198] sm:$0xff] }
  0x53   :  { %462 = vmatpush1.bf16.msra.mxu1 %v461_v17  ;;  %v493_v3 = vpack.c.bf16 %v282_v62, %v280_v61  ;;  %v495_v4 = vpack.c.bf16 %v287_v1, %v285_v63  ;;  %v284_v5 = vld [vmem:[#allocation8 + $0x180] sm:$0xff]  ;;  %v286_v6 = vld [vmem:[#allocation8 + $0x190] sm:$0xff]  ;;  %v289_v7 = vld [vmem:[#allocation8 + $0x1a8] sm:$0xff]  ;;  %v85_v17 = vstv %s747_s2 }
  0x54   :  { %442 = vmatpush1.bf16.msra.mxu0 %v441_v49  ;;  %464 = vmatprep.subr.bf16.mxu1 %v463_v18  ;;  %v272_v49 = vld [vmem:[#allocation8 + $0x120] sm:$0xff]  ;;  %v291_v8 = vld [vmem:[#allocation8 + $0x1b8] sm:$0xff]  ;;  %v497_v9 = vpack.c.bf16 %v286_v6, %v284_v5  ;;  %v290_v12 = vld [vmem:[#allocation8 + $0x1b0] sm:$0xff] }
  0x55   :  { %444 = vmatprep.subr.bf16.mxu0 %v443_v50  ;;  %v274_v50 = vld [vmem:[#allocation8 + $0x130] sm:$0xff]  ;;  %v499_v10 = vpack.c.bf16 %v291_v8, %v289_v7  ;;  %v288_v11 = vld [vmem:[#allocation8 + $0x1a0] sm:$0xff]  ;;  %v293_v13 = vld [vmem:[#allocation8 + $0x1c8] sm:$0xff] }
  0x56   :  { %v295_v14 = vld [vmem:[#allocation8 + $0x1d8] sm:$0xff]  ;;  %v501_v15 = vpack.c.bf16 %v290_v12, %v288_v11  ;;  %v292_v45 = vld [vmem:[#allocation8 + $0x1c0] sm:$0xff]  ;;  %v146_v55 = vld [vmem:[%s749_s4] sm:$0x3]  ;;  %s630_s4 = smov [#allocation9]  }
  0x57   :  { %466 = vmatpush1.bf16.msra.mxu1 %v465_v23  ;;  %v503_v16 = vpack.c.bf16 %v295_v14, %v293_v13  ;;  %s401_s21 = sshll.u32 %s630_s4, 4  ;;  %s402_s21 = int_to_ptr.vmem [resolvable:$true] %s401_s21 }
  0x58   :  { %446 = vmatpush1.bf16.msra.mxu0 %v445_v53  ;;  %468 = vmatprep.subr.bf16.mxu1 %v467_v24  ;;  %v485_v53 = vpack.c.bf16 %v274_v50, %v272_v49  ;;  %v296_v49 = vld [vmem:[#allocation8 + $0x1e0] sm:$0xff]  ;;  %v298_v50 = vld [vmem:[#allocation8 + $0x1f0] sm:$0xff]  ;;  %s594_s22 = scalar_lea.vmem %s402_s21, 64  ;;  %p599_p11 = scmp.lt.s32.totalorder %s402_s21, %s402_s21 }
  0x59   :  { %v509_v51 = vpack.c.bf16 %v298_v50, %v296_v49  ;;  %p595_p10 = scmp.ne.s32.totalorder %s402_s21, %s594_s22  ;;  %p600_p12 = scmp.lt.s32.totalorder %s594_s22, %s594_s22 }
  0x5b   :  { %470 = vmatpush1.bf16.msra.mxu1 %v469_v29  ;;  %p601_p13 = por %p600_p12, %p599_p11 }
  0x5c   :  { %472 = vmatprep.subr.bf16.mxu1 %v471_v30 }
  0x5d   :  { %p602_p0 = pnand %p601_p13, %p595_p10 }
  0x5f   :  { %474 = vmatpush1.bf16.msra.mxu1 %v473_v35 }
  0x60   :  { %476 = vmatprep.subr.bf16.mxu1 %v475_v36 }
  0x63   :  { %478 = vmatpush1.bf16.msra.mxu1 %v477_v41 }
  0x64   :  { %480 = vmatprep.subr.bf16.mxu1 %v479_v42 }
  0x67   :  { %482 = vmatpush1.bf16.msra.mxu1 %v481_v47  ;;  %v297_v47 = vld [vmem:[#allocation8 + $0x1e8] sm:$0xff] }
  0x68   :  { %484 = vmatprep.subr.bf16.mxu1 %v483_v48 }
  0x6b   :  { %486 = vmatpush1.bf16.msra.mxu1 %v485_v53  ;;  %v149_v53 = vshrl.u32 %v148_v52, 7 }
  0x6c   :  { %488 = vmatprep.subr.bf16.mxu1 %v487_v54 }
  0x6d   :  { %v150_v54 = vsub.s32 0, %v149_v53  ;;  %v154_v56 = vsub.s32 1, %v149_v53 }
  0x6f   :  { %490 = vmatpush1.bf16.msra.mxu1 %v489_v59  ;;  %v151_v57 = vrot.slane %v146_v55, %v150_v54  ;;  %v155_v58 = vrot.slane %v146_v55, %v154_v56 }
  0x70   :  { %492 = vmatprep.subr.bf16.mxu1 %v491_v60 }
  0x73   :  { %494 = vmatpush1.bf16.msra.mxu1 %v493_v3  ;;  %v300_v3 = vld [vmem:[%s751_s6] sm:$0x3] }
  0x74   :  { %496 = vmatprep.subr.bf16.mxu1 %v495_v4  ;;  %v305_v4 = vrot.slane %v300_v3, %v150_v54  ;;  %v309_v5 = vrot.slane %v300_v3, %v154_v56 }
  0x77   :  { %498 = vmatpush1.bf16.msra.mxu1 %v497_v9 }
  0x78   :  { %500 = vmatprep.subr.bf16.mxu1 %v499_v10 }
  0x7b   :  { %502 = vmatpush1.bf16.msra.mxu1 %v501_v15 }
  0x7c   :  { %504 = vmatprep.subr.bf16.mxu1 %v503_v16 }
  0xc8   :  { %v81_v18 = vpop.xlane.xlu0 %80 }
  0xc9   :  { %v86_v19 = vadd.f32 %v85_v17, %v81_v18 }
  0xcb   :  { %v412_v20 = vmul.f32 -1.442695, %v86_v19 }
  0xcc   :  { %v83_v21 = vpop.xlane.xlu0 %82 }
  0xcd   :  { %520 = vpow2.f32 %v412_v20  ;;  %v87_v22 = vadd.f32 %v85_v17, %v83_v21 }
  0xcf   :  { %v413_v23 = vmul.f32 -1.442695, %v87_v22 }
  0xd1   :  { %522 = vpow2.f32 %v413_v23 }
  0xd7   :  { %v521_v24 = vpop.eup %520 }
  0xd8   :  { %v94_v25 = vadd.f32 1.0, %v521_v24 }
  0xda   :  { %524 = vrcp.f32 %v94_v25 }
  0xdb   :  { %v523_v26 = vpop.eup %522 }
  0xdc   :  { %v95_v27 = vadd.f32 1.0, %v523_v26 }
  0xde   :  { %526 = vrcp.f32 %v95_v27 }
  0xe4   :  { %v525_v28 = vpop.eup %524 }
  0xe5   :  { %v100_v29 = vmul.f32 %v525_v28, %v713_v0  ;;  %v294_v0 = vld [vmem:[#allocation8 + $0x1d0] sm:$0xff] }
  0xe6   :  { %v505_v46 = vpack.c.bf16 %v294_v0, %v292_v45 }
  0xe7   :  { %v102_v30 = vrot.slane %v100_v29, 4 }
  0xe8   :  { %v527_v31 = vpop.eup %526  ;;  %506 = vmatpush1.bf16.msra.mxu1 %v505_v46 }
  0xe9   :  { %v101_v32 = vmul.f32 %v527_v31, %v718_v2  ;;  %v103_v33 = vadd.f32 %v102_v30, %v100_v29  ;;  %v299_v2 = vld [vmem:[#allocation8 + $0x1f8] sm:$0xff] }
  0xea   :  { %v507_v48 = vpack.c.bf16 %v299_v2, %v297_v47 }
  0xeb   :  { %v104_v34 = vrot.slane %v103_v33, 2  ;;  %v108_v35 = vrot.slane %v101_v32, 4 }
  0xec   :  { %508 = vmatprep.subr.bf16.mxu1 %v507_v48 }
  0xed   :  { %v105_v36 = vadd.f32 %v104_v34, %v103_v33  ;;  %v109_v37 = vadd.f32 %v108_v35, %v101_v32  ;;  %510 = vmatpush1.bf16.msra.mxu1 %v509_v51 }
  0xef   :  { %v110_v38 = vrot.slane %v109_v37, 2  ;;  %v106_v39 = vrot.slane %v105_v36, 1 }
  0xf1   :  { %v111_v40 = vadd.f32 %v110_v38, %v109_v37  ;;  %v107_v42 = vadd.f32 %v106_v39, %v105_v36 }
  0xf3   :  { %v112_v41 = vrot.slane %v111_v40, 1 }
  0xf5   :  { %v113_v43 = vadd.f32 %v112_v41, %v111_v40 }
  0xf7   :  { %v161_v44 = vsel %vm160_vm0, %v113_v43, %v107_v42 }
  0xf8   :  { %228 = vmatmul.mubr.f32.vlgmr.msra.gmra.mrb[0].mxu0 %v161_v44 }
 0x1cb   :  { %v229_v59 = vpop.f32.mrb[0].mxu0 }
 0x1cc   :  { %v230_v60 = vadd.f32 %v229_v59, %v151_v57  ;;  %v231_v61 = vpop.f32.mrb[1].mxu0 }
 0x1cd   :  { %v232_v62 = vadd.f32 %v231_v61, %v155_v58 }
 0x1ce   :  { %v234_v1 = vmax.f32 %v230_v60, 0.0 }
 0x1cf   :  { %v235_v63 = vmax.f32 %v232_v62, 0.0 }
 0x1d1   :  { %376 = vmatprep.mubr.f32.mxu1 %v235_v63 }
 0x1d2   :  { %377 = vmatmul.mubr.f32.vlgmr.msra.gmra.mrb[0].mxu1 %v234_v1 }
 0x2a5   :  { %v378_v6 = vpop.f32.mrb[0].mxu1 }
 0x2a6   :  { %v379_v7 = vadd.f32 %v378_v6, %v305_v4  ;;  %v380_v8 = vpop.f32.mrb[1].mxu1 }
 0x2a7   :  { %v381_v9 = vadd.f32 %v380_v8, %v309_v5 }
 0x2a9   :  { %v385_v10 = vcombine.low %v379_v7, %v381_v9 }
 0x2ab   :  { %414 = vst.sshfl [vmem:[#allocation9] sm:$0x33 pattern:$0x76325410] %v385_v10 }
 0x2ac   :  { %605 = shalt.err (!%p602_p0)
}
 0x2ad   :  { %s606_s24 = scalar_lea.hbm %s752_s7, 64 }
 0x2ae   :  { %p607_p1 = scmp.ne.s32.totalorder %s752_s7, %s606_s24  ;;  %p610_p2 = scmp.lt.u32.totalorder %s606_s24, %s752_s7 }
 0x2b0   :  { %p612_p3 = pnand %p610_p2, %p607_p1 }
 0x2b2   :  { %615 = shalt.err (!%p612_p3)
}
 0x2b3   :  { %404 = dma.vmem_to_hbm [thread:$0]  %s402_s21, 64, %s752_s7, [#allocation5]  }
 0x2b4   :  { %620 = dma.done.wait [#allocation5], 64  }
 0x2b5   :  { %621 = vsyncadd [#allocation5], 4294967232 }
 0x2b6   :  { %408 = vsyncpa [#allocation4], 1 }
 0x2b7   :  { %409 = vsyncpa [#allocation7], 1 }
 0x2b8   :  { %410 = vsyncpa [#allocation5], 1 }

</bundles_post_ra>
